<compile_context>
chip_gen: v5e
topology: v5e:2x2
jax: 0.10.0
libtpu: 0.0.40
codegen_flags: <defaults>
</compile_context>

<pallas_src>
import functools

import jax
import jax.numpy as jnp
import numpy as np
from jax.experimental import pallas as pl
from jax.experimental.pallas import tpu as pltpu

_TAG_LANES = 128                 # class dim padded to a multiple of 128 lanes
_NEG = -1e30                     # large-negative fill for padded class lanes
_VMEM_BUDGET = 24 * 1024 * 1024  # headroom under vmem_limit_bytes=32 MiB (v7x: 64 MiB phys)
_MAX_TILE_M = 1024               # ~86% of HBM roofline; larger only adds VMEM pressure


def _cdiv(a, b):
    return -(-a // b)


def _round_up(v, m):
    return _cdiv(v, m) * m


def _round_up8(v):
    return max(8, _round_up(v, 8))


def _choose_tiling(n_rows, n_in, t_pad):
    """Pick (tile_m, num_tiles) for the 1-D token grid."""
    # (a) VMEM: double-buffered f32 x tile dominates; add f32 (T, t_pad) temps,
    #     the resident w/b buffers and the small lane-dense tag/pred/loss blocks.
    fixed = 2 * n_in * t_pad * 2 + 4 * t_pad * 4
    per_row = 2 * n_in * 4 + 6 * t_pad * 4 + 64
    cap = min(_MAX_TILE_M, max(8, (_VMEM_BUDGET - fixed) // per_row))
    # (b) at least 2 tiles whenever possible so both v7x TensorCores get work.
    cap = min(cap, _round_up8(_cdiv(n_rows, 2)))
    cap = max(8, (cap // 8) * 8)
    # (c) largest tile <= cap whose padding waste stays under ~10% of n_rows.
    waste_cap = max(8, n_rows // 10)
    tile = cap
    while tile > 8 and _cdiv(n_rows, tile) * tile - n_rows > waste_cap:
        tile -= 8
    num_tiles = _cdiv(n_rows, tile)
    # (d) prefer an even tile count (balanced across v7x's two cores).
    if num_tiles > 1 and num_tiles % 2 == 1:
        even_tile = _round_up8(_cdiv(n_rows, num_tiles + 1))
        even_tiles = _cdiv(n_rows, even_tile)
        if even_tiles % 2 == 0 and even_tiles * even_tile - n_rows <= waste_cap:
            tile, num_tiles = even_tile, even_tiles
    return tile, num_tiles


def _classify_kernel(x_ref, w_ref, b_ref, tag_ref, pred_ref, loss_ref, *,
                     tag_size, compute_loss):
    # x arrives f32 (no HBM prepass); bf16 cast is a VPU op hidden under the DMA.
    x = x_ref[...].astype(jnp.bfloat16)     # (TILE_M, n_in)
    w = w_ref[...]                          # (n_in, t_pad) bf16, VMEM resident
    b = b_ref[...]                          # (1, t_pad)    f32, VMEM resident

    # hidden2tag Linear on the MXU, f32 accumulation.
    logits = jnp.dot(x, w, preferred_element_type=jnp.float32) + b   # (TILE_M, t_pad)

    # Mask padded class lanes so they never win max/argmax nor enter the lse.
    lane = jax.lax.broadcasted_iota(jnp.int32, logits.shape, 1)
    logits = jnp.where(lane < tag_size, logits, _NEG)

    # Lane-dense prediction row (argmax of logits == argmax of log_softmax);
    # the sublane->lane relayout of the reduce result rides the idle XLU.
    pred_ref[...] = jnp.argmax(logits, axis=1).astype(jnp.int32)[None, None, :]

    if compute_loss:
        # Gold tags arrive lane-dense; tiny lane->sublane relayout on the XLU.
        tag_col = tag_ref[0, 0, :][:, None]                   # (TILE_M, 1) int32
        # Numerically stable log-sum-exp in f32 (log_softmax never materialized).
        m = jnp.max(logits, axis=1, keepdims=True)
        shifted = logits - m
        lse = jnp.log(jnp.sum(jnp.exp(shifted), axis=1, keepdims=True))
        # NLL (size_average=False): -logp[i, tag_i] = lse_i - shifted[i, tag_i].
        # Pad / out-of-bounds rows carry tag == -1 -> match no lane -> exactly 0;
        # any NaN from ragged garbage rows only sits in the unselected branch.
        onehot = lane == tag_col
        per_lane = jnp.sum(jnp.where(onehot, lse - shifted, 0.0),
                           axis=0, keepdims=True)             # (1, t_pad)
        loss_ref[...] = per_lane[None]                         # (1, 1, t_pad)
    else:
        # Eval mode: skip the EUP exp/log chain entirely.
        loss_ref[...] = jnp.zeros(loss_ref.shape, loss_ref.dtype)


@functools.partial(jax.jit, static_argnames=("tag_size", "compute_loss"))
def _run_classify(x, w, b, tags, *, tag_size, compute_loss):
    n_rows, n_in = x.shape
    num_tiles, _, tile_m = tags.shape
    t_pad = w.shape[1]
    kernel = functools.partial(_classify_kernel, tag_size=tag_size,
                               compute_loss=compute_loss)
    pred, loss_parts = pl.pallas_call(
        kernel,
        grid=(num_tiles,),
        in_specs=[
            pl.BlockSpec((tile_m, n_in), lambda i: (i, 0)),     # x tile (double-buffered, ragged last)
            pl.BlockSpec((n_in, t_pad), lambda i: (0, 0)),      # w, VMEM resident
            pl.BlockSpec((1, t_pad), lambda i: (0, 0)),         # b, VMEM resident
            pl.BlockSpec((1, 1, tile_m), lambda i: (i, 0, 0)),  # gold tags, lane-dense
        ],
        out_specs=(
            pl.BlockSpec((1, 1, tile_m), lambda i: (i, 0, 0)),  # predictions, lane-dense
            pl.BlockSpec((1, 1, t_pad), lambda i: (i, 0, 0)),   # per-tile loss partials
        ),
        out_shape=(
            jax.ShapeDtypeStruct((num_tiles, 1, tile_m), jnp.int32),
            jax.ShapeDtypeStruct((num_tiles, 1, t_pad), jnp.float32),
        ),
        compiler_params=pltpu.CompilerParams(
            dimension_semantics=("parallel",),    # no cross-tile state -> v7x 2-TC shard
            vmem_limit_bytes=32 * 1024 * 1024,    # tile chooser budgets ~24 MiB
        ),
    )(x, w, b, tags)
    return pred.reshape(-1), jnp.sum(loss_parts)


class ClassifyLayerPallas:
    """JAX/Pallas port of seqlabel.modules.ClassifyLayer (forward only)."""

    def __init__(self, n_in, tag_size, key):
        self.n_in = n_in
        self.tag_size = tag_size
        t_pad = _round_up(tag_size, _TAG_LANES)     # handles tag_size > 128 too
        kw, kb = jax.random.split(key)
        bound = 1.0 / (n_in ** 0.5)                 # nn.Linear default uniform init
        w = jax.random.uniform(kw, (n_in, tag_size), jnp.float32, -bound, bound)
        b = jax.random.uniform(kb, (1, tag_size), jnp.float32, -bound, bound)
        # bf16 weights + in-kernel bf16 activations => ~1e-3 relative error vs a
        # pure-f32 reference; keep these in f32 if exact parity is required.
        self.w_pad = jnp.pad(w, ((0, 0), (0, t_pad - tag_size))).astype(jnp.bfloat16)
        self.b_pad = jnp.pad(b, ((0, 0), (0, t_pad - tag_size)))
        self.training = True

    def forward(self, x, y):
        # x: (batch, max_len, n_in) activations; y: list of per-sequence gold tags
        batch, max_len, n_in = x.shape
        assert n_in == self.n_in
        n_rows = batch * max_len
        t_pad = self.w_pad.shape[1]
        tile_m, num_tiles = _choose_tiling(n_rows, n_in, t_pad)

        # Gold tags scattered into the padded (num_tiles*tile_m) row layout,
        # lane-dense; -1 marks pad slots (matches no class -> zero loss).
        tags_np = np.full((num_tiles * tile_m,), -1, np.int32)
        for i, seq in enumerate(y):
            tags_np[i * max_len: i * max_len + len(seq)] = np.asarray(seq, np.int32)
        tags = jnp.asarray(tags_np.reshape(num_tiles, 1, tile_m))

        # No host-side cast / pad of x: the kernel streams f32 straight from HBM
        # (ragged last tile handled by the grid) and casts to bf16 in-register.
        x_flat = x.reshape(n_rows, n_in)

        pred_flat, loss = _run_classify(
            x_flat, self.w_pad, self.b_pad, tags,
            tag_size=self.tag_size, compute_loss=self.training)

        # Host round-trip only because the module's contract returns Python lists.
        # TODO(synk): callers that can consume device arrays should skip this sync.
        pred_host = np.asarray(jax.device_get(pred_flat))
        tag_list = []
        for i, seq in enumerate(y):
            start = i * max_len
            tag_list.append([int(p) for p in pred_host[start: start + len(seq)]])

        if self.training:
            return tag_list, loss
        return tag_list, jnp.float32(0.0)


if __name__ == "__main__":
    key = jax.random.PRNGKey(0)
    k1, k2, kp = jax.random.split(key, 3)

    n_in, tag_size = 32, 8
    layer = ClassifyLayerPallas(n_in, tag_size, kp)

    def reference(x, y):
        batch, max_len, _ = x.shape
        xf = x.reshape(-1, n_in).astype(jnp.bfloat16)
        logits = jnp.dot(xf, layer.w_pad,
                         preferred_element_type=jnp.float32) + layer.b_pad
        logits = logits[:, :tag_size]
        logp = jax.nn.log_softmax(logits, axis=1)
        pred = np.asarray(jnp.argmax(logits, axis=1))
        idx, gold = [], []
        for i, seq in enumerate(y):
            idx += [i * max_len + t for t in range(len(seq))]
            gold += list(seq)
        loss = float(-jnp.sum(logp[jnp.asarray(idx), jnp.asarray(gold)]))
        preds = [[int(p) for p in pred[i * max_len: i * max_len + len(seq)]]
                 for i, seq in enumerate(y)]
        return preds, loss

    def check(x, y):
        layer.training = True
        tag_list, loss = layer.forward(x, y)
        loss = jax.block_until_ready(loss)
        ref_preds, ref_loss = reference(x, y)
        assert len(tag_list) == len(y)
        assert all(len(tag_list[i]) == len(y[i]) for i in range(len(y)))
        assert tag_list == ref_preds, (tag_list, ref_preds)
        assert bool(jnp.isfinite(loss))
        assert abs(float(loss) - ref_loss) <= 1e-2 + 1e-2 * abs(ref_loss), \
            (float(loss), ref_loss)
        # eval mode: identical predictions, zero loss, no softmax/NLL work
        layer.training = False
        tag_list_e, loss_e = layer.forward(x, y)
        assert tag_list_e == ref_preds
        assert float(loss_e) == 0.0
        layer.training = True

    # Case 1: token count divides the tile exactly (batch=2, max_len=8 -> 16 rows,
    # 2 tiles of 8), exercising tag=-1 pad-row masking.
    y1 = [[1, 3, 2, 0, 4, 5, 1, 2], [2, 2, 1, 0, 3]]
    x1 = jax.random.normal(k1, (2, 8, n_in), jnp.float32)
    check(x1, y1)

    # Case 2: ragged last tile (batch=3, max_len=7 -> 21 rows, 3 tiles of 8),
    # exercising the out-of-bounds garbage-row masking of the loss.
    y2 = [[0, 1, 2, 3, 4, 5, 6], [3, 1, 4, 1, 5], [2, 7, 1]]
    x2 = jax.random.normal(k2, (3, 7, n_in), jnp.float32)
    check(x2, y2)

    print("KERNEL_OK")
</pallas_src>

<mosaic_0001>
module attributes {stable_mosaic.version = 11 : i64} {
  func.func @_classify_kernel(%arg0: i32, %arg1: memref<8x32xf32, #tpu.memory_space<vmem>>, %arg2: memref<32x128xbf16, #tpu.memory_space<vmem>>, %arg3: memref<1x128xf32, #tpu.memory_space<vmem>>, %arg4: memref<1x1x8xi32, #tpu.memory_space<vmem>>, %arg5: memref<1x1x8xi32, #tpu.memory_space<vmem>>, %arg6: memref<1x1x128xf32, #tpu.memory_space<vmem>>) attributes {dimension_semantics = [#tpu.dimension_semantics<parallel>], iteration_bounds = array<i64: 2>, scalar_prefetch = 0 : i64, scratch_operands = 0 : i64, tpu.core_type = #tpu.core_type<tc>, window_params = [{transform_indices = @transform_0, window_bounds = array<i64: 8, 32>}, {pipeline_mode = #tpu.pipeline_mode<synchronous>, transform_indices = @transform_1, window_bounds = array<i64: 32, 128>}, {pipeline_mode = #tpu.pipeline_mode<synchronous>, transform_indices = @transform_2, window_bounds = array<i64: 1, 128>}, {transform_indices = @transform_3, window_bounds = array<i64: 1, 1, 8>}, {transform_indices = @transform_4, window_bounds = array<i64: 1, 1, 8>}, {transform_indices = @transform_5, window_bounds = array<i64: 1, 1, 128>}]} {
    %c0 = arith.constant 0 : index
    %c0_0 = arith.constant 0 : index
    %0 = vector.load %arg1[%c0, %c0_0] : memref<8x32xf32, #tpu.memory_space<vmem>>, vector<8x32xf32>
    %1 = arith.truncf %0 : vector<8x32xf32> to vector<8x32xbf16>
    %c0_1 = arith.constant 0 : index
    %c0_2 = arith.constant 0 : index
    %2 = vector.load %arg2[%c0_1, %c0_2] : memref<32x128xbf16, #tpu.memory_space<vmem>>, vector<32x128xbf16>
    %c0_3 = arith.constant 0 : index
    %c0_4 = arith.constant 0 : index
    %3 = vector.load %arg3[%c0_3, %c0_4] : memref<1x128xf32, #tpu.memory_space<vmem>>, vector<1x128xf32>
    %cst = arith.constant dense<0.000000e+00> : vector<8x128xf32>
    %4 = tpu.matmul %1, %2, %cst {dimension_numbers = #tpu.dot_dimension_numbers<[1], [0], [0], [1], [0, 0, 1, 1], [], []>} : vector<8x32xbf16>, vector<32x128xbf16>, vector<8x128xf32> -> vector<8x128xf32>
    %5 = vector.broadcast %3 : vector<1x128xf32> to vector<8x128xf32>
    %6 = arith.addf %4, %5 : vector<8x128xf32>
    %7 = tpu.iota {dimensions = array<i32: 1>} : vector<8x128xi32>
    %c8_i32 = arith.constant 8 : i32
    %8 = vector.broadcast %c8_i32 : i32 to vector<8x128xi32>
    %9 = arith.cmpi slt, %7, %8 : vector<8x128xi32>
    %cst_5 = arith.constant -1.000000e+30 : f32
    %10 = vector.broadcast %cst_5 : f32 to vector<8x128xf32>
    %11 = arith.select %9, %6, %10 : vector<8x128xi1>, vector<8x128xf32>
    %12 = tpu.reduce_index %11 {axis = 1 : i32, kind = #tpu.reduction_kind<arg_max>} : vector<8x128xf32> -> vector<8xi32>
    %13 = vector.shape_cast %12 : vector<8xi32> to vector<1x1x8xi32>
    %c0_6 = arith.constant 0 : index
    %c0_7 = arith.constant 0 : index
    %c0_8 = arith.constant 0 : index
    %14 = vector.load %arg5[%c0_6, %c0_7, %c0_8] : memref<1x1x8xi32, #tpu.memory_space<vmem>>, vector<1x1x8xi32>
    tpu.vector_store %arg5[%c0_6, %c0_7, %c0_8], %13 {strides = array<i32>} : memref<1x1x8xi32, #tpu.memory_space<vmem>>, vector<1x1x8xi32>,
    %c0_9 = arith.constant 0 : index
    %c0_10 = arith.constant 0 : index
    %c0_11 = arith.constant 0 : index
    %15 = vector.load %arg4[%c0_9, %c0_10, %c0_11] : memref<1x1x8xi32, #tpu.memory_space<vmem>>, vector<1x1x8xi32>
    %16 = vector.shape_cast %15 : vector<1x1x8xi32> to vector<8xi32>
    %17 = vector.shape_cast %16 : vector<8xi32> to vector<8x1xi32>
    %cst_12 = arith.constant dense<0xFF800000> : vector<8xf32>
    %18 = vector.multi_reduction <maximumf>, %11, %cst_12 [1] : vector<8x128xf32> to vector<8xf32>
    %19 = vector.shape_cast %18 : vector<8xf32> to vector<8x1xf32>
    %20 = vector.broadcast %19 : vector<8x1xf32> to vector<8x128xf32>
    %21 = arith.subf %11, %20 : vector<8x128xf32>
    %22 = math.exp %21 : vector<8x128xf32>
    %cst_13 = arith.constant dense<0.000000e+00> : vector<8xf32>
    %23 = vector.multi_reduction <add>, %22, %cst_13 [1] : vector<8x128xf32> to vector<8xf32>
    %24 = vector.shape_cast %23 : vector<8xf32> to vector<8x1xf32>
    %25 = math.log %24 : vector<8x1xf32>
    %26 = vector.broadcast %17 : vector<8x1xi32> to vector<8x128xi32>
    %27 = arith.cmpi eq, %7, %26 : vector<8x128xi32>
    %28 = vector.broadcast %25 : vector<8x1xf32> to vector<8x128xf32>
    %29 = arith.subf %28, %21 : vector<8x128xf32>
    %cst_14 = arith.constant 0.000000e+00 : f32
    %30 = vector.broadcast %cst_14 : f32 to vector<8x128xf32>
    %31 = arith.select %27, %29, %30 : vector<8x128xi1>, vector<8x128xf32>
    %cst_15 = arith.constant dense<0.000000e+00> : vector<128xf32>
    %32 = vector.multi_reduction <add>, %31, %cst_15 [0] : vector<8x128xf32> to vector<128xf32>
    %33 = vector.shape_cast %32 : vector<128xf32> to vector<1x128xf32>
    %34 = vector.shape_cast %33 : vector<1x128xf32> to vector<1x1x128xf32>
    %c0_16 = arith.constant 0 : index
    %c0_17 = arith.constant 0 : index
    %c0_18 = arith.constant 0 : index
    %35 = vector.load %arg6[%c0_16, %c0_17, %c0_18] : memref<1x1x128xf32, #tpu.memory_space<vmem>>, vector<1x1x128xf32>
    tpu.vector_store %arg6[%c0_16, %c0_17, %c0_18], %34 {strides = array<i32>} : memref<1x1x128xf32, #tpu.memory_space<vmem>>, vector<1x1x128xf32>,
    return
  }
  func.func @transform_0(%arg0: i32) -> (i32, i32) {
    %c0_i32 = arith.constant 0 : i32
    %c0_i32_0 = arith.constant 0 : i32
    return %arg0, %c0_i32 : i32, i32
  }
  func.func @transform_1(%arg0: i32) -> (i32, i32) {
    %c0_i32 = arith.constant 0 : i32
    %c0_i32_0 = arith.constant 0 : i32
    %c0_i32_1 = arith.constant 0 : i32
    return %c0_i32, %c0_i32_0 : i32, i32
  }
  func.func @transform_2(%arg0: i32) -> (i32, i32) {
    %c0_i32 = arith.constant 0 : i32
    %c0_i32_0 = arith.constant 0 : i32
    %c0_i32_1 = arith.constant 0 : i32
    return %c0_i32, %c0_i32_0 : i32, i32
  }
  func.func @transform_3(%arg0: i32) -> (i32, i32, i32) {
    %c0_i32 = arith.constant 0 : i32
    %c0_i32_0 = arith.constant 0 : i32
    %c0_i32_1 = arith.constant 0 : i32
    return %arg0, %c0_i32, %c0_i32_0 : i32, i32, i32
  }
  func.func @transform_4(%arg0: i32) -> (i32, i32, i32) {
    %c0_i32 = arith.constant 0 : i32
    %c0_i32_0 = arith.constant 0 : i32
    %c0_i32_1 = arith.constant 0 : i32
    return %arg0, %c0_i32, %c0_i32_0 : i32, i32, i32
  }
  func.func @transform_5(%arg0: i32) -> (i32, i32, i32) {
    %c0_i32 = arith.constant 0 : i32
    %c0_i32_0 = arith.constant 0 : i32
    %c0_i32_1 = arith.constant 0 : i32
    return %arg0, %c0_i32, %c0_i32_0 : i32, i32, i32
  }
}

</mosaic_0001>

<bundles_post_ra>
// kernel: _run_classify.1
= control target key start
LH: loop header
LB: loop body
LE: loop exit
PB: predicated region body
PF: predicated region fallthrough
CT: control target
= control target key end

     0   :  { %11 = vsyncpa [#allocation3], 0  ;;  %s860_s0 = inlined_call_operand.hbm [shape: f32[16,32], index: 0, kind: input, shape index: {}]   ;;  %s861_s1 = inlined_call_operand.hbm [shape: bf16[32,128], index: 1, kind: input, shape index: {}]   ;;  %s862_s2 = inlined_call_operand.hbm [shape: f32[1,128], index: 2, kind: input, shape index: {}]   ;;  %s863_s3 = inlined_call_operand.vmem [shape: s32[2,1,8], index: 3, kind: input, shape index: {}]   ;;  %s864_s4 = inlined_call_operand.vmem [shape: s32[2,1,8], index: 4, kind: output, shape index: {0}]   ;;  %s865_s5 = inlined_call_operand.vmem [shape: f32[2,1,128], index: 5, kind: output, shape index: {1}]  }
   0x1   :  { %13 = vsyncpa [#allocation3 + $0x1], 0 }
   0x2   :  { %14 = vsyncpa [#allocation5], 0  ;;  %s740_s18 = smov 0   ;;  %s742_s19 = smov 0  }
   0x3   :  { %s744_s20 = smov 0   ;;  %s746_s21 = smov 0  }
   0x4 LB: > { %s182_s24 = sshll.u32 %s861_s1, 4  ;;  %s764_s25 = sadd.s32 4294967295, %s704_s21   ;;  %s704_s21 = sphi %s746_s21, %s872_s21   ;;  %s700_s20 = sphi %s744_s20, %s871_s20   ;;  %s696_s19 = sphi %s742_s19, %s870_s19   ;;  %s692_s18 = sphi %s740_s18, %s869_s18   ;;  %s183_s24 = int_to_ptr.hbm [resolvable:$true] %s182_s24 }
   0x5   : > { %p483_p0 = scmp.ge.s32.totalorder %s704_s21, 1  ;;  %p41_p1 = scmp.eq.s32.totalorder %s764_s25, 0 }
   0x6   : > { %p171_p2 = scmp.lt.s32.totalorder %s704_s21, 3  ;;  %s706_s27 = smov [#allocation4]  }
   0x7   : > { %s184_s28 = sshll.u32 %s706_s27, 4  ;;  %s197_s6 = sshll.u32 %s862_s2, 4  ;;  %s185_s28 = int_to_ptr.vmem [resolvable:$true] %s184_s28  ;;  %s198_s6 = int_to_ptr.hbm [resolvable:$true] %s197_s6 }
   0x8   : > { %p769_p3 = pnand %p483_p0, %p171_p2  ;;  %s707_s7 = smov [#allocation6]  }
   0x9   : > { %s199_s8 = sshll.u32 %s707_s7, 4  ;;  %s708_s9 = smov 64   ;;  %s200_s8 = int_to_ptr.vmem [resolvable:$true] %s199_s8 }
   0xa   : > { %p516_p4 = pneg %p769_p3  ;;  %s709_s10 = smov 4  }
   0xb   : > { %s781_s11 = sadd.s32 1, %s704_s21   ;;  %s27_s13 = sadd.s32 1, %s700_s20 }
   0xc   : > { %p517_p5 = pnand %p516_p4, %p41_p1  ;;  %s24_s12 = ssub.s32 %s704_s21, %s781_s11 }
   0xd   : > { %p25_p6 = scmp.eq.s32.totalorder %s24_s12, 0  ;;  %p34_p7 = scmp.ne.s32.totalorder %s700_s20, %s696_s19 }
   0xe   : > { %519 = dma.hbm_to_vmem [thread:$0]  (!%p517_p5), %s183_s24, 256, %s185_s28, [#allocation5], %s708_s9, %s708_s9, %s709_s10  }
   0xf   : > { %522 = dma.hbm_to_vmem [thread:$0]  (!%p517_p5), %s198_s6, 16, %s200_s8, [#allocation5]  }
  0x10   : > { %p35_p8 = scmp.eq.s32.totalorder %s704_s21, 0  ;;  %p40_p9 = scmp.ne.s32.totalorder %s696_s19, %s692_s18 }
  0x11   : > { %s792_s14 = scalar_select %p25_p6, %s700_s20, %s27_s13  }
  0x12   : > { %p796_p10 = por %p41_p1, %p40_p9  ;;  %p529_p11 = scmp.lt.s32.totalorder %s704_s21, 2 }
  0x13   : > { %s210_s16 = sand.u32 1, %s700_s20   ;;  %s488_s17 = sshll.u32 %s704_s21, 3 }
  0x14   : > { %p36_p12 = por %p35_p8, %p34_p7  ;;  %s487_s22 = sshll.u32 %s210_s16, 3 }
  0x15   : > { %s218_s27 = scalar_lea.hbm %s860_s0, %s488_s17  ;;  %s214_s29 = scalar_lea.vmem [#allocation2], %s487_s22 }
  0x16   : > { %s220_s28 = sshll.u32 %s218_s27, 4  ;;  %s222_s30 = sshll.u32 %s214_s29, 4  ;;  %s221_s28 = int_to_ptr.hbm [resolvable:$true] %s220_s28  ;;  %s223_s30 = int_to_ptr.vmem [resolvable:$true] %s222_s30 }
  0x17   : > { %p806_p13 = pnand %p529_p11, %p36_p12  ;;  %s211_s6 = scalar_lea.sflag [#allocation3], %s210_s16 }
  0x18   : > { %s636_s7 = sshra.s32 %s221_s28, 4  ;;  %s643_s10 = scalar_lea.hbm %s860_s0, 16  ;;  %s637_s7 = int_to_ptr.hbm [resolvable:$true] %s636_s7 }
  0x19   : > { %s638_s21 = scalar_lea.hbm %s637_s7, 8  ;;  %p640_p2 = pneg %p806_p13 }
  0x1a   : > { %p639_p0 = scmp.ne.s32.totalorder %s637_s7, %s638_s21  ;;  %p644_p6 = scmp.lt.s32.totalorder %s637_s7, %s860_s0 }
  0x1b   : > { %p645_p7 = scmp.lt.s32.totalorder %s643_s10, %s638_s21 }
  0x1c   : > { %p641_p4 = pnand %p640_p2, %p639_p0 }
  0x1d   : > { %p646_p8 = por %p645_p7, %p644_p6 }
  0x1e   : > { %p642_p5 = pneg %p641_p4 }
  0x20   : > { %p647_p9 = pnand %p646_p8, %p642_p5 }
  0x22   : > { %650 = shalt.err (!%p647_p9)
}
  0x23   : > { %526 = dma.hbm_to_vmem [thread:$0]  (!%p806_p13), %s221_s28, 128, %s223_s30, %s211_s6  }
  0x24   : > { %237 = sbr.rel (%p769_p3) target bundleno = 449 (0x1c1), region = 36  ;;  %s239_s16 = sand.u32 (!%p769_p3), 1, %s696_s19  }
  0x25   : > { %s490_s17 = sshll.u32 (!%p769_p3), %s239_s16, 3  ;;  %s240_s22 = scalar_lea.sflag (!%p769_p3), [#allocation3], %s239_s16 }
  0x26   : > { %s243_s23 = scalar_lea.vmem (!%p769_p3), [#allocation2], %s490_s17 }
  0x29   : > { %683 = dma.done.wait (%p796_p10), %s240_s22, 128  }
  0x2a   : > { %685 = vsyncadd (%p796_p10), %s240_s22, 4294967168 }
  0x2b   : > { %687 = dma.done.wait (%p41_p1), [#allocation5], 272  }
  0x2c   : > { %689 = vsyncadd (%p41_p1), [#allocation5], 4294967024  ;;  %v334_v0 = vlaneseq  ;;  %p285_p3 = scmp.lt.s32.totalorder %s764_s25, 1  ;;  %v505_v2 = vld [vmem:[#allocation4 + $0x8] sm:$0xff]  ;;  %v504_v4 = vld [vmem:[#allocation4] sm:$0xff]  ;;  %vm317_vm0 = vcmask 261120  }
  0x2d   : > { %327 = vmatpush.bf16.msra.mxu0 %v505_v2  ;;  %v295_v5 = vld [vmem:[%s243_s23] sm:$0xff]  ;;  %vm341_vm2 = vcmask 57344  }
  0x2e   : > { %v346_v1 = vshrl.u32 %v334_v0, 7  ;;  %s874_s25 = smov (!%p285_p3, %s764_s25), 1  ;;  %v296_v6 = vpack.c.bf16 %v295_v5, %v295_v5  ;;  %v335_v7 = vand.u32 127, %v334_v0  ;;  %v571_v8 = vld [vmem:[#allocation6] ss:$0 sm:$0xff] }
  0x2f   : > { %s287_s15 = scalar_lea.vmem %s863_s3, %s874_s25  ;;  %s290_s29 = scalar_lea.vmem %s864_s4, %s874_s25 }
  0x30   : > { %568 = vset.pattern.permute.xlu1 %v346_v1  ;;  %569 = vset.pattern.permute.xlu0 %v346_v1  ;;  %v570_v3 = vld [vmem:[%s287_s15] ss:$0 sm:$0xff]  ;;  %vm336_vm1 = vcmp.lt.s32.totalorder %v335_v7, 8  ;;  %s293_s6 = scalar_lea.vmem %s865_s5, %s874_s25 }
  0x31   : > { %328 = vmatpush.bf16.msra.mxu0 %v504_v4 }
  0x34   : > { %501 = vmatmul.msk.bf16.vlgmr.msra.gmra.mxu0 %vm317_vm0, %v296_v6 }
  0x38   : > { %349 = vperm.xlu1 %568, %v570_v3  }
  0xaa   : > { %v350_v13 = vpop.permute.xlu1 %349 }
  0xab   : > { %vm360_vm3 = vcmp.eq.s32.totalorder %v335_v7, %v350_v13 }
  0xb1   : > { %v330_v9 = vpop.f32.mrf.mxu0 }
  0xb2   : > { %v331_v10 = vadd.f32 %v571_v8, %v330_v9 }
  0xb4   : > { %v337_v11 = vsel %vm336_vm1, %v331_v10, -1e+30 }
  0xb5   : > { %338 = vmax.index.xlane.f32.xlu1 %v337_v11  ;;  %351 = vmax.xlane.f32.xlu0 %v337_v11 }
  0xb9   : > { %v332_v12 = vpop.f32.mrf.mxu0 }
 0x128   : > { %v339_v14 = vpop.xlane.xlu1 %338  ;;  %v352_v15 = vpop.xlane.xlu0 %351 }
 0x129   : > { %v340_v16 = vperm.slane %v339_v14, %v335_v7  ;;  %v353_v17 = vsub.f32 %v337_v11, %v352_v15 }
 0x12b   : > { %342 = vst.msk [vmem:[%s290_s29] sm:$0x1] %vm341_vm2, %v340_v16  ;;  %v354_v18 = vmul.f32 1.442695, %v353_v17 }
 0x12d   : > { %572 = vpow2.f32 %v354_v18 }
 0x133   : > { %v573_v19 = vpop.eup %572 }
 0x134   : > { %356 = vadd.xlane.f32.xlu0 %v573_v19 }
 0x1a7   : > { %v357_v20 = vpop.xlane.xlu0 %356 }
 0x1a8   : > { %574 = vlog2.f32 %v357_v20 }
 0x1ae   : > { %v575_v21 = vpop.eup %574 }
 0x1af   : > { %v359_v22 = vmul.f32 0.6931472, %v575_v21 }
 0x1b1   : > { %v361_v23 = vsub.f32 %v359_v22, %v353_v17 }
 0x1b3   : > { %v362_v24 = vsel %vm360_vm3, %v361_v23, 0.0 }
 0x1b4   : > { %v363_v25 = vrot.slane %v362_v24, 4 }
 0x1b6   : > { %v364_v26 = vadd.f32 %v363_v25, %v362_v24 }
 0x1b8   : > { %v365_v27 = vrot.slane %v364_v26, 2 }
 0x1ba   : > { %v366_v28 = vadd.f32 %v365_v27, %v364_v26 }
 0x1bc   : > { %v367_v29 = vrot.slane %v366_v28, 1 }
 0x1be   : > { %v368_v30 = vadd.f32 %v367_v29, %v366_v28 }
 0x1c0   : > { %369 = vst [vmem:[%s293_s6] sm:$0x1] %v368_v30 }
 0x1c1 PF: > { %p17_p1 = scmp.ge.s32.totalorder %s781_s11, 4   ;;  %s869_s18 = smov %s696_s19 }
 0x1c2   : > { %s870_s19 = smov %s700_s20  ;;  %s871_s20 = smov %s792_s14 }
 0x1c3   : > { %s872_s21 = smov %s781_s11  ;;  %19 = sbr.rel (!%p17_p1) target bundleno = 4 (0x4), region = 99 }
 0x1c8   :  { %399 = vsyncpa [#allocation3], 1 }
 0x1c9   :  { %401 = vsyncpa [#allocation3 + $0x1], 1 }
 0x1ca   :  { %402 = vsyncpa [#allocation5], 1 }

</bundles_post_ra>
